<compile_context>
chip_gen: v5e
topology: v5e:2x2
jax: 0.10.0
libtpu: 0.0.40
codegen_flags: <defaults>
</compile_context>

<pallas_src>
import functools
import numpy as np
import jax
import jax.numpy as jnp
from jax.experimental import pallas as pl
from jax.experimental.pallas import tpu as pltpu

PRIMITIVES = ['max_pool_3x3', 'avg_pool_3x3', 'skip_connect',
              'sep_conv_3x3', 'sep_conv_5x5', 'dil_conv_3x3', 'dil_conv_5x5']
BN_EPS = 1e-5

VMEM = functools.partial(pl.BlockSpec, memory_space=pltpu.MemorySpace.VMEM)
SMEM = functools.partial(pl.BlockSpec, memory_space=pltpu.MemorySpace.SMEM)
PARALLEL1 = pltpu.CompilerParams(dimension_semantics=("parallel",))


# --------------------------------------------------------------------------
# Pallas kernels
# --------------------------------------------------------------------------

def _conv_bn_kernel_factory(relu_in):
    """(C_out, K) @ (K, L) matmul fused with training-mode BatchNorm."""
    def kern(w_ref, p_ref, g_ref, b_ref, o_ref):
        p = p_ref[...]
        if relu_in:
            p = jnp.maximum(p, 0.0)
        o = jnp.dot(w_ref[...].astype(jnp.bfloat16), p.astype(jnp.bfloat16),
                    preferred_element_type=jnp.float32)
        inv_l = 1.0 / o.shape[1]
        mean = jnp.sum(o, axis=1, keepdims=True) * inv_l
        var = jnp.maximum(
            jnp.sum(o * o, axis=1, keepdims=True) * inv_l - mean * mean, 0.0)
        scale = jax.lax.rsqrt(var + BN_EPS) * g_ref[...]
        shift = b_ref[...] - mean * scale
        o_ref[...] = o * scale + shift
    return kern


def _dw_kernel_factory(k, dil, Ho, Wo, relu_in):
    """Depthwise conv (stride 1): taps generated in-kernel from a padded tile."""
    def kern(x_ref, w_ref, o_ref):
        acc = None
        for t in range(k * k):
            di = (t // k) * dil
            dj = (t % k) * dil
            tap = x_ref[:, di:di + Ho, dj:dj + Wo]
            if relu_in:
                tap = jnp.maximum(tap, 0.0)
            term = tap * w_ref[t]               # w_ref[t]: (C, 1, 1) broadcast
            acc = term if acc is None else acc + term
        o_ref[...] = acc
    return kern


def _pool_kernel_factory(kind, Ho, Wo):
    def kern_max(x_ref, o_ref):
        acc = None
        for t in range(9):
            tap = x_ref[:, t // 3:t // 3 + Ho, t % 3:t % 3 + Wo]
            acc = tap if acc is None else jnp.maximum(acc, tap)
        o_ref[...] = acc

    def kern_avg(x_ref, inv_ref, o_ref):
        acc = None
        for t in range(9):
            tap = x_ref[:, t // 3:t // 3 + Ho, t % 3:t % 3 + Wo]
            acc = tap if acc is None else acc + tap
        o_ref[...] = acc * inv_ref[...]

    return kern_max if kind == 'max' else kern_avg


def _bn_noaffine_kernel(x_ref, o_ref):
    x = x_ref[...]
    inv_l = 1.0 / x.shape[1]
    mean = jnp.sum(x, axis=1, keepdims=True) * inv_l
    var = jnp.maximum(
        jnp.sum(x * x, axis=1, keepdims=True) * inv_l - mean * mean, 0.0)
    o_ref[...] = (x - mean) * jax.lax.rsqrt(var + BN_EPS)


def _accum_kernel_factory(n):
    """out = sum_i coeff[i] * x_i  (coeffs in SMEM, branches are separate refs)."""
    def kern(*refs):
        c_ref = refs[0]
        o_ref = refs[n + 1]
        acc = refs[1][...] * c_ref[0, 0]
        for i in range(1, n):
            acc = acc + refs[i + 1][...] * c_ref[i, 0]
        o_ref[...] = acc
    return kern


def _head_kernel(x_ref, w_ref, b_ref, o_ref):
    pooled = jnp.mean(x_ref[...], axis=2)                        # (C, N)
    o_ref[...] = jnp.dot(w_ref[...], pooled,
                         preferred_element_type=jnp.float32) + b_ref[...]


# --------------------------------------------------------------------------
# Kernel wrappers (all called from inside jitted op-level functions)
# --------------------------------------------------------------------------

def conv_bn(w, p, gamma, beta, relu_in):
    """w: (C_out, K), p: (K, L) -> BN(conv)(C_out, L), lane-dense output."""
    C_out, K = w.shape
    L = p.shape[1]
    tm = 128 if C_out % 128 == 0 else C_out
    return pl.pallas_call(
        _conv_bn_kernel_factory(relu_in),
        grid=(C_out // tm,),
        in_specs=[pl.BlockSpec((tm, K), lambda m: (m, 0)),
                  pl.BlockSpec((K, L), lambda m: (0, 0)),
                  pl.BlockSpec((tm, 1), lambda m: (m, 0)),
                  pl.BlockSpec((tm, 1), lambda m: (m, 0))],
        out_specs=pl.BlockSpec((tm, L), lambda m: (m, 0)),
        out_shape=jax.ShapeDtypeStruct((C_out, L), jnp.float32),
        compiler_params=PARALLEL1,
    )(w, p, gamma, beta)


def conv1x1_bn(x, w, gamma=None, beta=None, relu_in=False):
    C_out = w.shape[0]
    C, N, H, W = x.shape
    g = jnp.ones((C_out, 1), jnp.float32) if gamma is None else gamma.reshape(C_out, 1)
    b = jnp.zeros((C_out, 1), jnp.float32) if beta is None else beta.reshape(C_out, 1)
    out = conv_bn(w.reshape(C_out, -1), x.reshape(C, N * H * W), g, b, relu_in)
    return out.reshape(C_out, N, H, W)


def depthwise_conv(x, w, k, pad, dil, relu_in=True):
    """x: (C, N, H, W), w: (C, 1, k, k) -> stride-1 depthwise conv (ReLU fused)."""
    C, N, H, W = x.shape
    Ho = H + 2 * pad - dil * (k - 1)
    Wo = W + 2 * pad - dil * (k - 1)
    Hp, Wp = H + 2 * pad, W + 2 * pad
    xp = jnp.pad(x, ((0, 0), (0, 0), (pad, pad), (pad, pad)))
    wk = w.reshape(C, k * k).T.reshape(k * k, C, 1, 1)
    return pl.pallas_call(
        _dw_kernel_factory(k, dil, Ho, Wo, relu_in),
        grid=(N,),
        in_specs=[pl.BlockSpec((C, None, Hp, Wp), lambda n: (0, n, 0, 0)),
                  pl.BlockSpec((k * k, C, 1, 1), lambda n: (0, 0, 0, 0))],
        out_specs=pl.BlockSpec((C, None, Ho, Wo), lambda n: (0, n, 0, 0)),
        out_shape=jax.ShapeDtypeStruct((C, N, Ho, Wo), jnp.float32),
        compiler_params=PARALLEL1,
    )(xp, wk)


_INV_COUNT_CACHE = {}


def _avg_inv_counts(H, W):
    key = (H, W)
    if key not in _INV_COUNT_CACHE:
        r, c = np.arange(H), np.arange(W)
        ch = np.minimum(r + 2, H) - np.maximum(r - 1, 0)
        cw = np.minimum(c + 2, W) - np.maximum(c - 1, 0)
        _INV_COUNT_CACHE[key] = (
            1.0 / (ch[:, None] * cw[None, :])).astype(np.float32).reshape(1, H, W)
    return _INV_COUNT_CACHE[key]


def max_pool_3x3(x, stride):
    C, N, H, W = x.shape
    xp = jnp.pad(x, ((0, 0), (0, 0), (1, 1), (1, 1)), constant_values=-jnp.inf)
    out = pl.pallas_call(
        _pool_kernel_factory('max', H, W),
        grid=(N,),
        in_specs=[pl.BlockSpec((C, None, H + 2, W + 2), lambda n: (0, n, 0, 0))],
        out_specs=pl.BlockSpec((C, None, H, W), lambda n: (0, n, 0, 0)),
        out_shape=jax.ShapeDtypeStruct((C, N, H, W), jnp.float32),
        compiler_params=PARALLEL1,
    )(xp)
    return out if stride == 1 else out[:, :, ::stride, ::stride]


def avg_pool_3x3(x, stride):
    # count_include_pad=False: divide by number of valid (non-padded) taps.
    C, N, H, W = x.shape
    xp = jnp.pad(x, ((0, 0), (0, 0), (1, 1), (1, 1)))
    inv = jnp.asarray(_avg_inv_counts(H, W))
    out = pl.pallas_call(
        _pool_kernel_factory('avg', H, W),
        grid=(N,),
        in_specs=[pl.BlockSpec((C, None, H + 2, W + 2), lambda n: (0, n, 0, 0)),
                  pl.BlockSpec((1, H, W), lambda n: (0, 0, 0))],
        out_specs=pl.BlockSpec((C, None, H, W), lambda n: (0, n, 0, 0)),
        out_shape=jax.ShapeDtypeStruct((C, N, H, W), jnp.float32),
        compiler_params=PARALLEL1,
    )(xp, inv)
    return out if stride == 1 else out[:, :, ::stride, ::stride]


def bn_noaffine(x):
    C, N, H, W = x.shape
    out = pl.pallas_call(
        _bn_noaffine_kernel,
        out_shape=jax.ShapeDtypeStruct((C, N * H * W), jnp.float32),
        in_specs=[VMEM()], out_specs=VMEM(),
    )(x.reshape(C, N * H * W))
    return out.reshape(C, N, H, W)


@jax.jit
def weighted_accum(tensors, coeffs):
    C, N, H, W = tensors[0].shape
    n = len(tensors)
    flats = [t.reshape(C, N * H * W) for t in tensors]
    out = pl.pallas_call(
        _accum_kernel_factory(n),
        out_shape=jax.ShapeDtypeStruct((C, N * H * W), jnp.float32),
        in_specs=[SMEM()] + [VMEM()] * n,
        out_specs=VMEM(),
    )(coeffs.reshape(n, 1).astype(jnp.float32), *flats)
    return out.reshape(C, N, H, W)


@jax.jit
def head(s1, fc_w, fc_b):
    C, N, H, W = s1.shape
    out = pl.pallas_call(
        _head_kernel,
        out_shape=jax.ShapeDtypeStruct((fc_w.shape[0], N), jnp.float32),
        in_specs=[VMEM(), VMEM(), VMEM()], out_specs=VMEM(),
    )(s1.reshape(C, N, H * W), fc_w, fc_b.reshape(-1, 1))
    return out.T


# --------------------------------------------------------------------------
# DARTS building blocks (forward only), activations in (C, N, H, W)
# --------------------------------------------------------------------------

@jax.jit
def relu_conv_bn_1x1(x, w):                       # ReLUConvBN, affine=False
    return conv1x1_bn(x, w, relu_in=True)


@jax.jit
def factorized_reduce(x, p):                      # affine=False
    o1 = conv1x1_bn(x[:, :, ::2, ::2], p['w1'], relu_in=True)
    o2 = conv1x1_bn(x[:, :, 1::2, 1::2], p['w2'], relu_in=True)
    return jnp.concatenate([o1, o2], axis=0)      # per-channel BN == per-half BN


def sep_conv(x, p, k, pad, stride):
    y = depthwise_conv(x, p['dw1'], k, pad, 1, relu_in=True)
    if stride != 1:
        y = y[:, :, ::stride, ::stride]
    y = conv1x1_bn(y, p['pw1'])
    y = depthwise_conv(y, p['dw2'], k, pad, 1, relu_in=True)   # middle ReLU fused
    y = conv1x1_bn(y, p['pw2'])
    return y


def dil_conv(x, p, k, pad, dil, stride):
    y = depthwise_conv(x, p['dw'], k, pad, dil, relu_in=True)
    if stride != 1:
        y = y[:, :, ::stride, ::stride]
    y = conv1x1_bn(y, p['pw'])
    return y


@functools.partial(jax.jit, static_argnames=('stride',))
def mixed_branches(x, p, *, stride):
    """All 7 primitive outputs for one MixedOp edge (PRIMITIVES order)."""
    outs = [bn_noaffine(max_pool_3x3(x, stride)),
            bn_noaffine(avg_pool_3x3(x, stride))]
    if stride == 1:
        outs.append(x)                                          # skip_connect
    else:
        outs.append(factorized_reduce(x, p['skip']))
    outs.append(sep_conv(x, p['sep3'], 3, 1, stride))
    outs.append(sep_conv(x, p['sep5'], 5, 2, stride))
    outs.append(dil_conv(x, p['dil3'], 3, 2, 2, stride))
    outs.append(dil_conv(x, p['dil5'], 5, 4, 2, stride))
    return outs


@functools.partial(jax.jit, static_argnames=('ksize', 'padding'))
def stem_forward(x, w, gamma, beta, *, ksize, padding):
    """Dense kxk conv (stride 1) + affine BN, via im2col feeding the fused kernel."""
    C_in, N, H, W = x.shape
    Ho = H + 2 * padding - (ksize - 1)
    Wo = W + 2 * padding - (ksize - 1)
    xp = jnp.pad(x, ((0, 0), (0, 0), (padding, padding), (padding, padding)))
    taps = [xp[:, :, i:i + Ho, j:j + Wo]
            for i in range(ksize) for j in range(ksize)]
    pm = jnp.stack(taps, axis=1).reshape(C_in * ksize * ksize, N * Ho * Wo)
    wm = w.reshape(w.shape[0], C_in * ksize * ksize)
    out = conv_bn(wm, pm, gamma.reshape(-1, 1), beta.reshape(-1, 1), False)
    return out.reshape(w.shape[0], N, Ho, Wo)


def cell_forward(s0, s1, cell_p, cfg, weights, steps=4, multiplier=4):
    if cfg['reduction_prev']:
        s0 = factorized_reduce(s0, cell_p['pre0'])
    else:
        s0 = relu_conv_bn_1x1(s0, cell_p['pre0']['w'])
    s1 = relu_conv_bn_1x1(s1, cell_p['pre1']['w'])
    states = [s0, s1]
    offset = 0
    for i in range(steps):
        tensors, coeffs = [], []
        for j, h in enumerate(states):
            stride = 2 if cfg['reduction'] and j < 2 else 1
            tensors += mixed_branches(h, cell_p['ops'][offset + j], stride=stride)
            coeffs.append(weights[offset + j])
        # one accumulate over every branch of every edge of this node
        s = weighted_accum(tensors, jnp.concatenate(coeffs))
        offset += len(states)
        states.append(s)
    return jnp.concatenate(states[-multiplier:], axis=0)


def network_forward(x_nchw, params, cell_cfgs, stem_cfg, steps=4, multiplier=4):
    x = jnp.transpose(x_nchw, (1, 0, 2, 3)).astype(jnp.float32)   # -> (C, N, H, W)
    s = stem_forward(x, params['stem_w'], params['stem_gamma'], params['stem_beta'],
                     ksize=stem_cfg['filter'], padding=stem_cfg['padding'])
    s0 = s1 = s
    weights = params['oneshot_alphas']        # oneshot mode: all-ones, no softmax
    for cell_p, cfg in zip(params['cells'], cell_cfgs):
        s0, s1 = s1, cell_forward(s0, s1, cell_p, cfg, weights, steps, multiplier)
    return head(s1, params['fc_w'], params['fc_b'])


# --------------------------------------------------------------------------
# Deterministic parameter initialization (shapes follow Network.__init__)
# --------------------------------------------------------------------------

class KeyGen:
    def __init__(self, key):
        self.key = key

    def rnd(self, shape, scale=0.1):
        self.key, sub = jax.random.split(self.key)
        return scale * jax.random.normal(sub, shape, jnp.float32)


def init_mixed_op(kg, C, stride):
    p = {}
    if stride != 1:
        p['skip'] = {'w1': kg.rnd((C // 2, C, 1, 1)),
                     'w2': kg.rnd((C // 2, C, 1, 1))}

    def sep(k):
        return {'dw1': kg.rnd((C, 1, k, k)), 'pw1': kg.rnd((C, C, 1, 1)),
                'dw2': kg.rnd((C, 1, k, k)), 'pw2': kg.rnd((C, C, 1, 1))}

    def dil(k):
        return {'dw': kg.rnd((C, 1, k, k)), 'pw': kg.rnd((C, C, 1, 1))}

    p['sep3'] = sep(3)
    p['sep5'] = sep(5)
    p['dil3'] = dil(3)
    p['dil5'] = dil(5)
    return p


def init_network(kg, C, num_classes, layers, stem_dict,
                 steps=4, multiplier=4, stem_multiplier=3):
    params, cell_cfgs = {}, []
    C_curr = stem_multiplier * C
    f = stem_dict['filter']
    params['stem_w'] = kg.rnd((C_curr, stem_dict['channels'], f, f))
    params['stem_gamma'] = jnp.ones((C_curr,), jnp.float32)
    params['stem_beta'] = jnp.zeros((C_curr,), jnp.float32)

    C_pp, C_p, C_curr = C_curr, C_curr, C
    cells = []
    reduction_prev = False
    for i in range(layers):
        if i in [layers // 3, 2 * layers // 3]:
            C_curr *= 2
            reduction = True
        else:
            reduction = False
        cell = {}
        if reduction_prev:
            cell['pre0'] = {'w1': kg.rnd((C_curr // 2, C_pp, 1, 1)),
                            'w2': kg.rnd((C_curr // 2, C_pp, 1, 1))}
        else:
            cell['pre0'] = {'w': kg.rnd((C_curr, C_pp, 1, 1))}
        cell['pre1'] = {'w': kg.rnd((C_curr, C_p, 1, 1))}
        ops = []
        for s in range(steps):
            for j in range(2 + s):
                stride = 2 if reduction and j < 2 else 1
                ops.append(init_mixed_op(kg, C_curr, stride))
        cell['ops'] = ops
        cells.append(cell)
        cell_cfgs.append({'reduction': reduction, 'reduction_prev': reduction_prev})
        reduction_prev = reduction
        C_pp, C_p = C_p, multiplier * C_curr

    params['cells'] = cells
    k = sum(1 for i in range(steps) for _ in range(2 + i))
    params['oneshot_alphas'] = jnp.ones((k, len(PRIMITIVES)), jnp.float32)
    params['fc_w'] = kg.rnd((num_classes, C_p))
    params['fc_b'] = jnp.zeros((num_classes,), jnp.float32)
    return params, cell_cfgs


# --------------------------------------------------------------------------

if __name__ == "__main__":
    root = jax.random.PRNGKey(0)
    x_key, p_key = jax.random.split(root)

    # Small config: C=4, num_classes=10, layers=2, stem on 3-channel 8x8 images.
    C, num_classes, layers = 4, 10, 2
    stem_dict = {'channels': 3, 'filter': 3, 'padding': 1}

    kg = KeyGen(p_key)
    params, cell_cfgs = init_network(kg, C, num_classes, layers, stem_dict)

    x = jax.random.normal(x_key, (2, stem_dict['channels'], 8, 8), jnp.float32)

    logits = network_forward(x, params, cell_cfgs, stem_dict)
    logits = jax.block_until_ready(logits)

    assert logits.shape == (2, num_classes), logits.shape
    assert bool(jnp.all(jnp.isfinite(logits)))
    print("KERNEL_OK")
</pallas_src>

<mosaic_0001>
module attributes {stable_mosaic.version = 11 : i64} {
  func.func @kern(%arg0: i32, %arg1: memref<12x27xf32, #tpu.memory_space<vmem>>, %arg2: memref<27x128xf32, #tpu.memory_space<vmem>>, %arg3: memref<12x1xf32, #tpu.memory_space<vmem>>, %arg4: memref<12x1xf32, #tpu.memory_space<vmem>>, %arg5: memref<12x128xf32, #tpu.memory_space<vmem>>) attributes {dimension_semantics = [#tpu.dimension_semantics<parallel>], iteration_bounds = array<i64: 1>, scalar_prefetch = 0 : i64, scratch_operands = 0 : i64, tpu.core_type = #tpu.core_type<tc>, window_params = [{transform_indices = @transform_0, window_bounds = array<i64: 12, 27>}, {pipeline_mode = #tpu.pipeline_mode<synchronous>, transform_indices = @transform_1, window_bounds = array<i64: 27, 128>}, {transform_indices = @transform_2, window_bounds = array<i64: 12, 1>}, {transform_indices = @transform_3, window_bounds = array<i64: 12, 1>}, {transform_indices = @transform_4, window_bounds = array<i64: 12, 128>}]} {
    %c0 = arith.constant 0 : index
    %c0_0 = arith.constant 0 : index
    %0 = vector.load %arg2[%c0, %c0_0] : memref<27x128xf32, #tpu.memory_space<vmem>>, vector<27x128xf32>
    %c0_1 = arith.constant 0 : index
    %c0_2 = arith.constant 0 : index
    %1 = vector.load %arg1[%c0_1, %c0_2] : memref<12x27xf32, #tpu.memory_space<vmem>>, vector<12x27xf32>
    %2 = arith.truncf %1 : vector<12x27xf32> to vector<12x27xbf16>
    %3 = arith.truncf %0 : vector<27x128xf32> to vector<27x128xbf16>
    %cst = arith.constant dense<0.000000e+00> : vector<12x128xf32>
    %4 = tpu.matmul %2, %3, %cst {dimension_numbers = #tpu.dot_dimension_numbers<[1], [0], [0], [1], [0, 0, 1, 1], [], []>} : vector<12x27xbf16>, vector<27x128xbf16>, vector<12x128xf32> -> vector<12x128xf32>
    %cst_3 = arith.constant dense<0.000000e+00> : vector<12xf32>
    %5 = vector.multi_reduction <add>, %4, %cst_3 [1] : vector<12x128xf32> to vector<12xf32>
    %6 = vector.shape_cast %5 : vector<12xf32> to vector<12x1xf32>
    %cst_4 = arith.constant 7.812500e-03 : f32
    %7 = vector.broadcast %cst_4 : f32 to vector<12x1xf32>
    %8 = arith.mulf %6, %7 : vector<12x1xf32>
    %9 = arith.mulf %4, %4 : vector<12x128xf32>
    %cst_5 = arith.constant dense<0.000000e+00> : vector<12xf32>
    %10 = vector.multi_reduction <add>, %9, %cst_5 [1] : vector<12x128xf32> to vector<12xf32>
    %11 = vector.shape_cast %10 : vector<12xf32> to vector<12x1xf32>
    %cst_6 = arith.constant 7.812500e-03 : f32
    %12 = vector.broadcast %cst_6 : f32 to vector<12x1xf32>
    %13 = arith.mulf %11, %12 : vector<12x1xf32>
    %14 = arith.mulf %8, %8 : vector<12x1xf32>
    %15 = arith.subf %13, %14 : vector<12x1xf32>
    %cst_7 = arith.constant 0.000000e+00 : f32
    %16 = vector.broadcast %cst_7 : f32 to vector<12x1xf32>
    %17 = arith.maximumf %15, %16 : vector<12x1xf32>
    %cst_8 = arith.constant 9.99999974E-6 : f32
    %18 = vector.broadcast %cst_8 : f32 to vector<12x1xf32>
    %19 = arith.addf %17, %18 : vector<12x1xf32>
    %20 = math.rsqrt %19 : vector<12x1xf32>
    %c0_9 = arith.constant 0 : index
    %c0_10 = arith.constant 0 : index
    %21 = vector.load %arg3[%c0_9, %c0_10] : memref<12x1xf32, #tpu.memory_space<vmem>>, vector<12x1xf32>
    %22 = arith.mulf %20, %21 : vector<12x1xf32>
    %c0_11 = arith.constant 0 : index
    %c0_12 = arith.constant 0 : index
    %23 = vector.load %arg4[%c0_11, %c0_12] : memref<12x1xf32, #tpu.memory_space<vmem>>, vector<12x1xf32>
    %24 = arith.mulf %8, %22 : vector<12x1xf32>
    %25 = arith.subf %23, %24 : vector<12x1xf32>
    %26 = vector.broadcast %22 : vector<12x1xf32> to vector<12x128xf32>
    %27 = arith.mulf %4, %26 : vector<12x128xf32>
    %28 = vector.broadcast %25 : vector<12x1xf32> to vector<12x128xf32>
    %29 = arith.addf %27, %28 : vector<12x128xf32>
    %c0_13 = arith.constant 0 : index
    %c0_14 = arith.constant 0 : index
    %30 = vector.load %arg5[%c0_13, %c0_14] : memref<12x128xf32, #tpu.memory_space<vmem>>, vector<12x128xf32>
    tpu.vector_store %arg5[%c0_13, %c0_14], %29 {strides = array<i32>} : memref<12x128xf32, #tpu.memory_space<vmem>>, vector<12x128xf32>,
    return
  }
  func.func @transform_0(%arg0: i32) -> (i32, i32) {
    %c0_i32 = arith.constant 0 : i32
    %c0_i32_0 = arith.constant 0 : i32
    return %arg0, %c0_i32 : i32, i32
  }
  func.func @transform_1(%arg0: i32) -> (i32, i32) {
    %c0_i32 = arith.constant 0 : i32
    %c0_i32_0 = arith.constant 0 : i32
    %c0_i32_1 = arith.constant 0 : i32
    return %c0_i32, %c0_i32_0 : i32, i32
  }
  func.func @transform_2(%arg0: i32) -> (i32, i32) {
    %c0_i32 = arith.constant 0 : i32
    %c0_i32_0 = arith.constant 0 : i32
    return %arg0, %c0_i32 : i32, i32
  }
  func.func @transform_3(%arg0: i32) -> (i32, i32) {
    %c0_i32 = arith.constant 0 : i32
    %c0_i32_0 = arith.constant 0 : i32
    return %arg0, %c0_i32 : i32, i32
  }
  func.func @transform_4(%arg0: i32) -> (i32, i32) {
    %c0_i32 = arith.constant 0 : i32
    %c0_i32_0 = arith.constant 0 : i32
    return %arg0, %c0_i32 : i32, i32
  }
}

</mosaic_0001>

<bundles_post_ra>
// kernel: stem_forward.1
= control target key start
LH: loop header
LB: loop body
LE: loop exit
PB: predicated region body
PF: predicated region fallthrough
CT: control target
= control target key end

     0   :  { %vm31_vm0 = vcmask 1044480   ;;  %vm32_vm1 = vcmask 1045504   ;;  %v147_v2 = vmov 65535   ;;  %vm27_vm2 = vcmask 220160   ;;  %s222_s1 = inlined_call_operand.vmem [shape: f32[27,128], index: 1, kind: input, shape index: {}]   ;;  %s223_s0 = inlined_call_operand.vmem [shape: f32[12,27], index: 0, kind: input, shape index: {}]   ;;  %s224_s2 = inlined_call_operand.vmem [shape: f32[12,1], index: 2, kind: input, shape index: {}]   ;;  %s225_s3 = inlined_call_operand.vmem [shape: f32[12,1], index: 3, kind: input, shape index: {}]   ;;  %s226_s4 = inlined_call_operand.vmem [shape: f32[12,128], index: 4, kind: output, shape index: {}]  }
   0x1   :  { %v20_v0 = vld [vmem:[%s222_s1 + $0x10] sm:$0xff]  ;;  %v21_v1 = vld [vmem:[%s222_s1 + $0x18] sm:$0x7]  ;;  %v33_v3 = vsel %vm31_vm0, 4294967295, %v147_v2  ;;  %v18_v6 = vld [vmem:[%s222_s1] sm:$0xff]  ;;  %vm54_vm3 = vcmask 1043456  }
   0x2   :  { %v26_v4 = vpack.c.bf16 %v21_v1, %v20_v0  ;;  %v34_v5 = vsel %vm32_vm1, %v33_v3, 0  ;;  %v19_v7 = vld [vmem:[%s222_s1 + $0x8] sm:$0xff]  ;;  %v22_v10 = vld [vmem:[%s223_s0] sm:$0xff]  ;;  %v148_v19 = vmov 0  }
   0x3   :  { %v25_v9 = vpack.c.bf16 %v19_v7, %v18_v6  ;;  %v23_v11 = vld [vmem:[%s223_s0 + $0x8] sm:$0xf]  ;;  %140 = vset.pattern.permute.xlu2 %v148_v19  ;;  %141 = vset.pattern.permute.xlu0 %v148_v19  ;;  %v97_v43 = vld [vmem:[%s224_s2] sm:$0xff] }
   0x4   :  { %v36_v8 = vand.u32 %v34_v5, %v26_v4  ;;  %v24_v12 = vpack.c.bf16 %v23_v11, %v22_v10  ;;  %142 = vset.pattern.permute.xlu1 %v148_v19  ;;  %v101_v48 = vld [vmem:[%s225_s3] sm:$0xff]  ;;  %v98_v53 = vld [vmem:[%s224_s2 + $0x8] sm:$0xf] }
   0x5   :  { %v102_v57 = vld [vmem:[%s225_s3 + $0x8] sm:$0xf] }
   0x6   :  { %44 = vmatpush.bf16.msra.mxu0 %v36_v8 }
   0xa   :  { %45 = vmatpush.bf16.msra.mxu0 %v25_v9 }
   0xd   :  { %137 = vmatmul.msk.bf16.vlgmr.msra.gmra.mxu0 %vm27_vm2, %v24_v12 }
  0x8a   :  { %v192_v13 = vpop.f32.mrf.mxu0 }
  0x8b   :  { %52 = vadd.xlane.f32.xlu0 %v192_v13  ;;  %v60_v14 = vmul.f32 %v192_v13, %v192_v13 }
  0x8d   :  { %62 = vadd.xlane.f32.xlu1 %v60_v14 }
  0x92   :  { %v197_v15 = vpop.f32.mrf.mxu0 }
  0x93   :  { %v61_v16 = vmul.f32 %v197_v15, %v197_v15  ;;  %v55_v17 = vsel %vm54_vm3, %v197_v15, 0.0 }
  0x94   :  { %56 = vadd.xlane.f32.xlu0 %v55_v17 }
  0x95   :  { %v64_v18 = vsel %vm54_vm3, %v61_v16, 0.0 }
  0x96   :  { %65 = vadd.xlane.f32.xlu1 %v64_v18 }
  0xfe   :  { %v53_v20 = vpop.xlane.xlu0 %52 }
  0xff   :  { %v58_v21 = vmul.f32 0.0078125, %v53_v20 }
 0x100   :  { %v63_v22 = vpop.xlane.xlu1 %62 }
 0x101   :  { %v69_v23 = vmul.f32 %v58_v21, %v58_v21  ;;  %v67_v24 = vmul.f32 0.0078125, %v63_v22 }
 0x103   :  { %v71_v25 = vsub.f32 %v67_v24, %v69_v23 }
 0x105   :  { %v73_v26 = vmax.f32 %v71_v25, 0.0 }
 0x107   :  { %v75_v27 = vadd.f32 1e-05, %v73_v26  ;;  %v57_v28 = vpop.xlane.xlu0 %56 }
 0x108   :  { %v59_v29 = vmul.f32 0.0078125, %v57_v28 }
 0x109   :  { %143 = vrsqrt.f32 %v75_v27  ;;  %v66_v30 = vpop.xlane.xlu1 %65  ;;  %vm83_vm5 = vweird.f32 %v75_v27 }
 0x10a   :  { %v70_v31 = vmul.f32 %v59_v29, %v59_v29  ;;  %v68_v32 = vmul.f32 0.0078125, %v66_v30 }
 0x10c   :  { %v72_v33 = vsub.f32 %v68_v32, %v70_v31 }
 0x10e   :  { %v74_v34 = vmax.f32 %v72_v33, 0.0 }
 0x10f   :  { %v144_v35 = vpop.eup %143 }
 0x110   :  { %v78_v36 = vmul.f32 %v144_v35, %v75_v27  ;;  %v76_v37 = vadd.f32 1e-05, %v74_v34  ;;  %vm84_vm4 = vweird.f32 %v144_v35 }
 0x111   :  { %vm85_vm6 = vmor %vm83_vm5, %vm84_vm4 }
 0x112   :  { %145 = vrsqrt.f32 %v76_v37  ;;  %v79_v38 = vmul.f32 %v144_v35, %v78_v36  ;;  %vm93_vm8 = vweird.f32 %v76_v37 }
 0x114   :  { %v80_v39 = vmul.f32 0.5, %v79_v38 }
 0x116   :  { %v81_v40 = vsub.f32 1.5, %v80_v39 }
 0x118   :  { %v146_v41 = vpop.eup %145  ;;  %v82_v42 = vmul.f32 %v144_v35, %v81_v40 }
 0x119   :  { %v88_v44 = vmul.f32 %v146_v41, %v76_v37  ;;  %vm94_vm7 = vweird.f32 %v146_v41 }
 0x11a   :  { %v86_v45 = vsel %vm85_vm6, %v144_v35, %v82_v42  ;;  %vm95_vm9 = vmor %vm93_vm8, %vm94_vm7 }
 0x11b   :  { %v89_v46 = vmul.f32 %v146_v41, %v88_v44  ;;  %v99_v47 = vmul.f32 %v97_v43, %v86_v45 }
 0x11d   :  { %v90_v49 = vmul.f32 0.5, %v89_v46  ;;  %109 = vperm.xlu2 %140, %v99_v47   ;;  %v103_v50 = vmul.f32 %v99_v47, %v58_v21 }
 0x11f   :  { %v91_v51 = vsub.f32 1.5, %v90_v49  ;;  %v105_v52 = vsub.f32 %v101_v48, %v103_v50 }
 0x121   :  { %121 = vperm.xlu0 %141, %v105_v52   ;;  %v92_v54 = vmul.f32 %v146_v41, %v91_v51 }
 0x123   :  { %v96_v55 = vsel %vm95_vm9, %v146_v41, %v92_v54 }
 0x124   :  { %v100_v56 = vmul.f32 %v98_v53, %v96_v55 }
 0x126   :  { %114 = vperm.xlu2 %140, %v100_v56   ;;  %v104_v58 = vmul.f32 %v100_v56, %v59_v29 }
 0x128   :  { %v106_v59 = vsub.f32 %v102_v57, %v104_v58 }
 0x12a   :  { %126 = vperm.xlu1 %142, %v106_v59  }
 0x177   :  { %v110_v60 = vpop.permute.xlu2 %109 }
 0x178   :  { %v117_v61 = vmul.f32 %v110_v60, %v192_v13 }
 0x180   :  { %v115_v0 = vpop.permute.xlu2 %114 }
 0x181   :  { %v118_v1 = vmul.f32 %v115_v0, %v197_v15 }
 0x193   :  { %v122_v62 = vpop.permute.xlu0 %121 }
 0x194   :  { %v129_v63 = vadd.f32 %v122_v62, %v117_v61 }
 0x196   :  { %131 = vst [vmem:[%s226_s4] sm:$0xff] %v129_v63 }
 0x19c   :  { %v127_v2 = vpop.permute.xlu1 %126 }
 0x19d   :  { %v130_v3 = vadd.f32 %v127_v2, %v118_v1 }
 0x19f   :  { %132 = vst [vmem:[%s226_s4 + $0x8] sm:$0xf] %v130_v3 }

</bundles_post_ra>
